<compile_context>
chip_gen: v6e
topology: v6e:2x2x1
jax: 0.10.0
libtpu: 0.0.40
codegen_flags: <defaults>
</compile_context>

<pallas_src>
import jax
import jax.numpy as jnp
from jax.experimental import pallas as pl
from jax.experimental.pallas import tpu as pltpu


def dwconv_kernel(f_ref, x3_ref, wf_ref, wx_ref, b_ref, o_ref):
    # f_ref : (tm*k, C)  gathered neighbour features (row = m*k + j)
    # x3_ref: (tm*k, 3)  window xyz offsets
    # wf_ref: (C, C)     feature part of the Linear weight
    # wx_ref: (3, C)     xyz part of the Linear weight
    # b_ref : (1, C)     bias
    # o_ref : (tm, C)    output features
    tm, C = o_ref.shape
    k = f_ref.shape[0] // tm

    # One large MXU matmul over the flattened feature tile + a small matmul
    # for the xyz coordinates (accumulated in f32).
    y = jnp.dot(f_ref[...], wf_ref[...], preferred_element_type=jnp.float32)
    y = y + jnp.dot(x3_ref[...], wx_ref[...], preferred_element_type=jnp.float32)

    # Max over the k neighbours first (XLU reduction), THEN bias + ReLU.
    # max_k(relu(y_k + b)) == relu(max_k(y_k) + b) since b is k-invariant and
    # ReLU is monotone -> identical result with k-times less elementwise work.
    o = jnp.max(y.reshape(tm, k, C), axis=1)          # (tm, C)
    o = jnp.maximum(o + b_ref[...], 0.0)              # bias + ReLU
    o_ref[...] = o.astype(o_ref.dtype)


def _round_up(x, m):
    return (x + m - 1) // m * m


def dwconv_forward(skin_features, dilated_windows, dilated_idx, weight, bias,
                   *, tm=512):
    """DWConv forward.

    skin_features  : (M, C)
    dilated_windows: (M, k, 3)
    dilated_idx    : (1, M, k) int32
    weight         : (C+3, C)   (Linear weight, input-major)
    bias           : (C,)
    returns        : (M, C)
    """
    M, C = skin_features.shape
    k = dilated_windows.shape[1]
    assert weight.shape == (C + 3, C)

    # ---- glue (XLA): row gather only (no concat, no (M,k,C+3) intermediate).
    idx = dilated_idx[0]                                   # (M, k)
    grouped = jnp.take(skin_features, idx, axis=0)         # (M, k, C)

    # ---- tile-size selection (tm multiple of 8; pad M up to a tile multiple).
    tm = max(8, min(tm, _round_up(M, 8)))
    tm = _round_up(tm, 8)
    Mp = _round_up(M, tm)
    if Mp // tm < 2 and Mp >= 16:
        # keep >= 2 parallel grid steps so both v7x TensorCores get work
        tm = _round_up(Mp // 2, 8)
        Mp = _round_up(M, tm)
    grid = Mp // tm

    pad = Mp - M
    if pad:
        grouped = jnp.pad(grouped, ((0, pad), (0, 0), (0, 0)))
        dilated_windows = jnp.pad(dilated_windows, ((0, pad), (0, 0), (0, 0)))

    # Flatten (m, k) -> rows so each grid step runs one big 2-D MXU matmul.
    feat2d = grouped.reshape(Mp * k, C)
    xyz2d = dilated_windows.reshape(Mp * k, 3)
    w_feat = weight[:C]                                    # (C, C)
    w_xyz = weight[C:]                                     # (3, C)
    bias2 = bias.reshape(1, C)

    out = pl.pallas_call(
        dwconv_kernel,
        out_shape=jax.ShapeDtypeStruct((Mp, C), skin_features.dtype),
        grid_spec=pltpu.PrefetchScalarGridSpec(
            num_scalar_prefetch=0,
            grid=(grid,),
            in_specs=[
                pl.BlockSpec((tm * k, C), lambda i: (i, 0)),   # features
                pl.BlockSpec((tm * k, 3), lambda i: (i, 0)),   # xyz
                pl.BlockSpec((C, C), lambda i: (0, 0)),        # W_feat
                pl.BlockSpec((3, C), lambda i: (0, 0)),        # W_xyz
                pl.BlockSpec((1, C), lambda i: (0, 0)),        # bias
            ],
            out_specs=pl.BlockSpec((tm, C), lambda i: (i, 0)),
        ),
        compiler_params=pltpu.CompilerParams(
            dimension_semantics=("parallel",),
            vmem_limit_bytes=32 * 1024 * 1024,
        ),
    )(feat2d, xyz2d, w_feat, w_xyz, bias2)
    return out[:M]


def reference_forward(skin_features, dilated_windows, dilated_idx, weight, bias):
    idx = dilated_idx[0]
    grouped = jnp.take(skin_features, idx, axis=0)
    x = jnp.concatenate([grouped, dilated_windows], axis=-1)
    y = jnp.maximum(x @ weight + bias, 0.0)
    return jnp.max(y, axis=-2)


def _make_inputs(key, M, C, k):
    Cin = C + 3
    k1, k2, k3, k4, k5 = jax.random.split(key, 5)
    skin_features = jax.random.normal(k1, (M, C), dtype=jnp.float32)
    dilated_windows = jax.random.normal(k2, (M, k, 3), dtype=jnp.float32)
    dilated_idx = jax.random.randint(k3, (1, M, k), 0, M, dtype=jnp.int32)
    bound = 1.0 / (Cin ** 0.5)   # PyTorch-style Linear init bound
    weight = jax.random.uniform(k4, (Cin, C), jnp.float32, -bound, bound)
    bias = jax.random.uniform(k5, (C,), jnp.float32, -bound, bound)
    return skin_features, dilated_windows, dilated_idx, weight, bias


if __name__ == "__main__":
    key = jax.random.PRNGKey(0)
    kA, kB = jax.random.split(key)

    # Case 1: M a multiple of the tile size.
    M, C, k = 64, 32, 8
    sf, dw, di, w, b = _make_inputs(kA, M, C, k)
    out = jax.block_until_ready(dwconv_forward(sf, dw, di, w, b))
    ref = reference_forward(sf, dw, di, w, b)
    assert out.shape == (M, C)
    assert jnp.allclose(out, ref, atol=1e-4, rtol=1e-4)

    # Case 2: ragged M (exercises the pad + tail-slice path).
    M2 = 50
    sf2, dw2, di2, w2, b2 = _make_inputs(kB, M2, C, k)
    out2 = jax.block_until_ready(dwconv_forward(sf2, dw2, di2, w2, b2))
    ref2 = reference_forward(sf2, dw2, di2, w2, b2)
    assert out2.shape == (M2, C)
    assert jnp.allclose(out2, ref2, atol=1e-4, rtol=1e-4)

    print("KERNEL_OK")
</pallas_src>

<mosaic_0001>
module attributes {stable_mosaic.version = 11 : i64} {
  func.func @dwconv_kernel(%arg0: i32, %arg1: memref<256x32xf32, #tpu.memory_space<vmem>>, %arg2: memref<256x3xf32, #tpu.memory_space<vmem>>, %arg3: memref<32x32xf32, #tpu.memory_space<vmem>>, %arg4: memref<3x32xf32, #tpu.memory_space<vmem>>, %arg5: memref<1x32xf32, #tpu.memory_space<vmem>>, %arg6: memref<32x32xf32, #tpu.memory_space<vmem>>) attributes {dimension_semantics = [#tpu.dimension_semantics<parallel>], iteration_bounds = array<i64: 2>, scalar_prefetch = 0 : i64, scratch_operands = 0 : i64, tpu.core_type = #tpu.core_type<tc>, window_params = [{transform_indices = @transform_0, window_bounds = array<i64: 256, 32>}, {transform_indices = @transform_1, window_bounds = array<i64: 256, 3>}, {pipeline_mode = #tpu.pipeline_mode<synchronous>, transform_indices = @transform_2, window_bounds = array<i64: 32, 32>}, {pipeline_mode = #tpu.pipeline_mode<synchronous>, transform_indices = @transform_3, window_bounds = array<i64: 3, 32>}, {pipeline_mode = #tpu.pipeline_mode<synchronous>, transform_indices = @transform_4, window_bounds = array<i64: 1, 32>}, {transform_indices = @transform_5, window_bounds = array<i64: 32, 32>}]} {
    %c0 = arith.constant 0 : index
    %c0_0 = arith.constant 0 : index
    %0 = vector.load %arg1[%c0, %c0_0] : memref<256x32xf32, #tpu.memory_space<vmem>>, vector<256x32xf32>
    %c0_1 = arith.constant 0 : index
    %c0_2 = arith.constant 0 : index
    %1 = vector.load %arg3[%c0_1, %c0_2] : memref<32x32xf32, #tpu.memory_space<vmem>>, vector<32x32xf32>
    %cst = arith.constant dense<0.000000e+00> : vector<256x32xf32>
    %2 = tpu.matmul %0, %1, %cst {dimension_numbers = #tpu.dot_dimension_numbers<[1], [0], [0], [1], [0, 0, 1, 1], [], []>} : vector<256x32xf32>, vector<32x32xf32>, vector<256x32xf32> -> vector<256x32xf32>
    %c0_3 = arith.constant 0 : index
    %c0_4 = arith.constant 0 : index
    %3 = vector.load %arg2[%c0_3, %c0_4] : memref<256x3xf32, #tpu.memory_space<vmem>>, vector<256x3xf32>
    %c0_5 = arith.constant 0 : index
    %c0_6 = arith.constant 0 : index
    %4 = vector.load %arg4[%c0_5, %c0_6] : memref<3x32xf32, #tpu.memory_space<vmem>>, vector<3x32xf32>
    %cst_7 = arith.constant dense<0.000000e+00> : vector<256x32xf32>
    %5 = tpu.matmul %3, %4, %cst_7 {dimension_numbers = #tpu.dot_dimension_numbers<[1], [0], [0], [1], [0, 0, 1, 1], [], []>} : vector<256x3xf32>, vector<3x32xf32>, vector<256x32xf32> -> vector<256x32xf32>
    %6 = arith.addf %2, %5 : vector<256x32xf32>
    %7 = vector.shape_cast %6 : vector<256x32xf32> to vector<32x8x32xf32>
    %cst_8 = arith.constant dense<0xFF800000> : vector<32x32xf32>
    %8 = vector.multi_reduction <maximumf>, %7, %cst_8 [1] : vector<32x8x32xf32> to vector<32x32xf32>
    %c0_9 = arith.constant 0 : index
    %c0_10 = arith.constant 0 : index
    %9 = vector.load %arg5[%c0_9, %c0_10] : memref<1x32xf32, #tpu.memory_space<vmem>>, vector<1x32xf32>
    %10 = vector.broadcast %9 : vector<1x32xf32> to vector<32x32xf32>
    %11 = arith.addf %8, %10 : vector<32x32xf32>
    %cst_11 = arith.constant 0.000000e+00 : f32
    %12 = vector.broadcast %cst_11 : f32 to vector<32x32xf32>
    %13 = arith.maximumf %11, %12 : vector<32x32xf32>
    %c0_12 = arith.constant 0 : index
    %c0_13 = arith.constant 0 : index
    %14 = vector.load %arg6[%c0_12, %c0_13] : memref<32x32xf32, #tpu.memory_space<vmem>>, vector<32x32xf32>
    tpu.vector_store %arg6[%c0_12, %c0_13], %13 {strides = array<i32>} : memref<32x32xf32, #tpu.memory_space<vmem>>, vector<32x32xf32>,
    return
  }
  func.func @transform_0(%arg0: i32) -> (i32, i32) {
    %c0_i32 = arith.constant 0 : i32
    %c0_i32_0 = arith.constant 0 : i32
    return %arg0, %c0_i32 : i32, i32
  }
  func.func @transform_1(%arg0: i32) -> (i32, i32) {
    %c0_i32 = arith.constant 0 : i32
    %c0_i32_0 = arith.constant 0 : i32
    return %arg0, %c0_i32 : i32, i32
  }
  func.func @transform_2(%arg0: i32) -> (i32, i32) {
    %c0_i32 = arith.constant 0 : i32
    %c0_i32_0 = arith.constant 0 : i32
    %c0_i32_1 = arith.constant 0 : i32
    return %c0_i32, %c0_i32_0 : i32, i32
  }
  func.func @transform_3(%arg0: i32) -> (i32, i32) {
    %c0_i32 = arith.constant 0 : i32
    %c0_i32_0 = arith.constant 0 : i32
    %c0_i32_1 = arith.constant 0 : i32
    return %c0_i32, %c0_i32_0 : i32, i32
  }
  func.func @transform_4(%arg0: i32) -> (i32, i32) {
    %c0_i32 = arith.constant 0 : i32
    %c0_i32_0 = arith.constant 0 : i32
    %c0_i32_1 = arith.constant 0 : i32
    return %c0_i32, %c0_i32_0 : i32, i32
  }
  func.func @transform_5(%arg0: i32) -> (i32, i32) {
    %c0_i32 = arith.constant 0 : i32
    %c0_i32_0 = arith.constant 0 : i32
    return %arg0, %c0_i32 : i32, i32
  }
}

</mosaic_0001>

<bundles_post_ra>
// kernel: tpu_custom_call.1
= control target key start
LH: loop header
LB: loop body
LE: loop exit
PB: predicated region body
PF: predicated region fallthrough
CT: control target
= control target key end

     0   :  { %s1733_s18 = smov 0   ;;  %s2041_s0 = inlined_call_operand.vmem [shape: f32[512,32], index: 0, kind: input, shape index: {}]   ;;  %s2042_s1 = inlined_call_operand.vmem [shape: f32[512,3], index: 1, kind: input, shape index: {}]   ;;  %s2043_s2 = inlined_call_operand.vmem [shape: f32[32,32], index: 2, kind: input, shape index: {}]   ;;  %s2044_s3 = inlined_call_operand.vmem [shape: f32[3,32], index: 3, kind: input, shape index: {}]   ;;  %s2045_s4 = inlined_call_operand.vmem [shape: f32[1,32], index: 4, kind: input, shape index: {}]   ;;  %s2046_s5 = inlined_call_operand.vmem [shape: f32[64,32], index: 5, kind: output, shape index: {}]  }
   0x1 LB: > { %s1433_s19 = sadd.s32 4294967295, %s1701_s18   ;;  %p1437_p0 = scmp.ge.s32.totalorder %s1701_s18, 1  ;;  %s1701_s18 = sphi %s1733_s18, %s15_s18  }
   0x2   : > { %p199_p1 = scmp.lt.s32.totalorder %s1701_s18, 3 }
   0x4   : > { %p200_p2 = pnand %p1437_p0, %p199_p1 }
   0x5   : > { %s1438_s24 = sshll.u32 (!%p200_p2), %s1433_s19, 5  ;;  %s1916_s15 = sshll.u32 (!%p200_p2), %s1433_s19, 2 }
   0x6   : > { %203 = sbr.rel (%p200_p2) target bundleno = 323 (0x143), region = 40  ;;  %p233_p3 = scmp.lt.s32.totalorder (!%p200_p2), %s1438_s24, 63 }
   0x7   : > { %p245_p4 = scmp.lt.s32.totalorder (!%p200_p2), %s1916_s15, 7 }
   0xb   : > { %v285_v0 = vld [vmem:[%s2043_s2 + $0x18] sm:$0xff]  ;;  %v284_v1 = vld [vmem:[%s2043_s2 + $0x10] sm:$0xff]  ;;  %vm416_vm0 = vcmask 1042432   ;;  %v318_v2 = vld [vmem:[%s2044_s3] sm:$0x7]  ;;  %s2048_s24 = smov (!%p233_p3, %s1438_s24), 63 }
   0xc   : > { %1631 = vmatprep.subr.mxu1 %v285_v0  ;;  %v283_v3 = vld [vmem:[%s2043_s2 + $0x8] sm:$0xff]  ;;  %1581 = vmatprep.subr.msk.mxu0 %vm416_vm0, %v318_v2  ;;  %v282_v4 = vld [vmem:[%s2043_s2] sm:$0xff]  ;;  %s1439_s6 = sshll.u32 %s2048_s24, 3  ;;  %vm319_vm1 = vcmask 23552   ;;  %vm645_vm2 = vcmask 261120   ;;  %vm1295_vm3 = vcmask 1041409  }
   0xd   : > { %1632 = vmatpush3.msra.mxu1 %v285_v0  ;;  %1582 = vmatpush3.msk.msra.mxu0 %vm416_vm0, %v318_v2  ;;  %s1761_s9 = scalar_lea.vmem %s2042_s1, %s1439_s6  ;;  %s1766_s12 = scalar_lea.vmem %s2041_s0, %s1439_s6  ;;  %vm1298_vm4 = vcmask 1042434   ;;  %vm1301_vm5 = vcmask 1043459   ;;  %vm1304_vm6 = vcmask 1044484   ;;  %vm1307_vm7 = vcmask 1045509  }
   0xe   : > { %1633 = vmatprep.subr.mxu1 %v284_v1  ;;  %v286_v5 = vld [vmem:[%s1761_s9] sm:$0xff]  ;;  %v287_v7 = vld [vmem:[%s1761_s9 + $0x8] sm:$0xff]  ;;  %v288_v9 = vld [vmem:[%s1761_s9 + $0x10] sm:$0xff]  ;;  %vm1310_vm8 = vcmask 1046534   ;;  %vm1313_vm9 = vcmask 1047559   ;;  %s2050_s15 = smov (!%p245_p4, %s1916_s15), 7 }
   0xf   : > { %1634 = vmatpush3.msra.mxu1 %v284_v1  ;;  %v250_v6 = vld [vmem:[%s1766_s12] sm:$0xff]  ;;  %1583 = vmatprep.mubr.msk.f32.mxu0 %vm319_vm1, %v286_v5  ;;  %v251_v8 = vld [vmem:[%s1766_s12 + $0x8] sm:$0xff]  ;;  %v252_v10 = vld [vmem:[%s1766_s12 + $0x10] sm:$0xff]  ;;  %s1443_s16 = sshll.u32 %s2050_s15, 3 }
  0x10   : > { %1635 = vmatprep.subr.mxu1 %v283_v3  ;;  %1639 = vmatprep.mubr.msk.f32.mxu1 %vm645_vm2, %v250_v6  ;;  %v289_v11 = vld [vmem:[%s1761_s9 + $0x18] sm:$0xff]  ;;  %v290_v13 = vld [vmem:[%s1761_s9 + $0x20] sm:$0xff]  ;;  %v291_v15 = vld [vmem:[%s1761_s9 + $0x28] sm:$0xff]  ;;  %s1949_s20 = scalar_lea.vmem %s2046_s5, %s1443_s16 }
  0x11   : > { %1636 = vmatpush3.msra.mxu1 %v283_v3  ;;  %1584 = vmatmul.mubr.msk.f32.vlgmr.msra.gmra.mxu0 %vm319_vm1, %v287_v7  ;;  %v253_v12 = vld [vmem:[%s1766_s12 + $0x18] sm:$0xff]  ;;  %v254_v14 = vld [vmem:[%s1766_s12 + $0x20] sm:$0xff]  ;;  %v255_v16 = vld [vmem:[%s1766_s12 + $0x28] sm:$0xff] }
  0x12   : > { %1637 = vmatprep.subr.mxu1 %v282_v4  ;;  %1586 = vmatprep.mubr.msk.f32.mxu0 %vm319_vm1, %v288_v9  ;;  %v292_v17 = vld [vmem:[%s1761_s9 + $0x30] sm:$0xff]  ;;  %v293_v19 = vld [vmem:[%s1761_s9 + $0x38] sm:$0xff]  ;;  %v294_v21 = vld [vmem:[%s1761_s9 + $0x40] sm:$0xff] }
  0x13   : > { %1638 = vmatpush3.msra.mxu1 %v282_v4  ;;  %v256_v18 = vld [vmem:[%s1766_s12 + $0x30] sm:$0xff]  ;;  %v257_v20 = vld [vmem:[%s1766_s12 + $0x38] sm:$0xff]  ;;  %v258_v22 = vld [vmem:[%s1766_s12 + $0x40] sm:$0xff] }
  0x14   : > { %1640 = vmatmul.mubr.msk.f32.vlgmr.msra.gmra.mxu1 %vm645_vm2, %v251_v8  ;;  %v295_v23 = vld [vmem:[%s1761_s9 + $0x48] sm:$0xff]  ;;  %v296_v25 = vld [vmem:[%s1761_s9 + $0x50] sm:$0xff]  ;;  %v297_v27 = vld [vmem:[%s1761_s9 + $0x58] sm:$0xff] }
  0x15   : > { %1642 = vmatprep.mubr.msk.f32.mxu1 %vm645_vm2, %v252_v10  ;;  %1587 = vmatmul.mubr.msk.f32.gmra.mxu0 %vm319_vm1, %v289_v11  ;;  %v259_v24 = vld [vmem:[%s1766_s12 + $0x48] sm:$0xff]  ;;  %v260_v26 = vld [vmem:[%s1766_s12 + $0x50] sm:$0xff]  ;;  %v261_v28 = vld [vmem:[%s1766_s12 + $0x58] sm:$0xff] }
  0x16   : > { %1589 = vmatprep.mubr.msk.f32.mxu0 %vm319_vm1, %v290_v13  ;;  %v298_v29 = vld [vmem:[%s1761_s9 + $0x60] sm:$0xff]  ;;  %v299_v31 = vld [vmem:[%s1761_s9 + $0x68] sm:$0xff]  ;;  %v300_v33 = vld [vmem:[%s1761_s9 + $0x70] sm:$0xff] }
  0x17   : > { %v262_v30 = vld [vmem:[%s1766_s12 + $0x60] sm:$0xff]  ;;  %v263_v32 = vld [vmem:[%s1766_s12 + $0x68] sm:$0xff]  ;;  %v264_v34 = vld [vmem:[%s1766_s12 + $0x70] sm:$0xff] }
  0x18   : > { %1643 = vmatmul.mubr.msk.f32.gmra.mxu1 %vm645_vm2, %v253_v12  ;;  %v301_v35 = vld [vmem:[%s1761_s9 + $0x78] sm:$0xff]  ;;  %v302_v37 = vld [vmem:[%s1761_s9 + $0x80] sm:$0xff]  ;;  %v303_v39 = vld [vmem:[%s1761_s9 + $0x88] sm:$0xff] }
  0x19   : > { %1645 = vmatprep.mubr.msk.f32.mxu1 %vm645_vm2, %v254_v14  ;;  %1590 = vmatmul.mubr.msk.f32.gmra.mxu0 %vm319_vm1, %v291_v15  ;;  %v265_v36 = vld [vmem:[%s1766_s12 + $0x78] sm:$0xff]  ;;  %v266_v38 = vld [vmem:[%s1766_s12 + $0x80] sm:$0xff]  ;;  %v267_v40 = vld [vmem:[%s1766_s12 + $0x88] sm:$0xff] }
  0x1a   : > { %1592 = vmatprep.mubr.msk.f32.mxu0 %vm319_vm1, %v292_v17  ;;  %v304_v41 = vld [vmem:[%s1761_s9 + $0x90] sm:$0xff]  ;;  %v305_v43 = vld [vmem:[%s1761_s9 + $0x98] sm:$0xff]  ;;  %v306_v45 = vld [vmem:[%s1761_s9 + $0xa0] sm:$0xff] }
  0x1b   : > { %v268_v42 = vld [vmem:[%s1766_s12 + $0x90] sm:$0xff]  ;;  %v269_v44 = vld [vmem:[%s1766_s12 + $0x98] sm:$0xff]  ;;  %v270_v46 = vld [vmem:[%s1766_s12 + $0xa0] sm:$0xff] }
  0x1c   : > { %1646 = vmatmul.mubr.msk.f32.gmra.mxu1 %vm645_vm2, %v255_v16  ;;  %v307_v47 = vld [vmem:[%s1761_s9 + $0xa8] sm:$0xff]  ;;  %v308_v49 = vld [vmem:[%s1761_s9 + $0xb0] sm:$0xff]  ;;  %v309_v51 = vld [vmem:[%s1761_s9 + $0xb8] sm:$0xff] }
  0x1d   : > { %1648 = vmatprep.mubr.msk.f32.mxu1 %vm645_vm2, %v256_v18  ;;  %1593 = vmatmul.mubr.msk.f32.gmra.mxu0 %vm319_vm1, %v293_v19  ;;  %v271_v48 = vld [vmem:[%s1766_s12 + $0xa8] sm:$0xff]  ;;  %v272_v50 = vld [vmem:[%s1766_s12 + $0xb0] sm:$0xff]  ;;  %v273_v52 = vld [vmem:[%s1766_s12 + $0xb8] sm:$0xff] }
  0x1e   : > { %1595 = vmatprep.mubr.msk.f32.mxu0 %vm319_vm1, %v294_v21  ;;  %v310_v53 = vld [vmem:[%s1761_s9 + $0xc0] sm:$0xff]  ;;  %v311_v55 = vld [vmem:[%s1761_s9 + $0xc8] sm:$0xff]  ;;  %v312_v57 = vld [vmem:[%s1761_s9 + $0xd0] sm:$0xff] }
  0x1f   : > { %v274_v54 = vld [vmem:[%s1766_s12 + $0xc0] sm:$0xff]  ;;  %v275_v56 = vld [vmem:[%s1766_s12 + $0xc8] sm:$0xff]  ;;  %v276_v58 = vld [vmem:[%s1766_s12 + $0xd0] sm:$0xff] }
  0x20   : > { %1649 = vmatmul.mubr.msk.f32.gmra.mxu1 %vm645_vm2, %v257_v20  ;;  %v313_v59 = vld [vmem:[%s1761_s9 + $0xd8] sm:$0xff]  ;;  %v314_v61 = vld [vmem:[%s1761_s9 + $0xe0] sm:$0xff]  ;;  %v315_v63 = vld [vmem:[%s1761_s9 + $0xe8] sm:$0xff] }
  0x21   : > { %1651 = vmatprep.mubr.msk.f32.mxu1 %vm645_vm2, %v258_v22  ;;  %1596 = vmatmul.mubr.msk.f32.gmra.mxu0 %vm319_vm1, %v295_v23  ;;  %v277_v60 = vld [vmem:[%s1766_s12 + $0xd8] sm:$0xff]  ;;  %v278_v62 = vld [vmem:[%s1766_s12 + $0xe0] sm:$0xff]  ;;  %v279_v0 = vld [vmem:[%s1766_s12 + $0xe8] sm:$0xff] }
  0x22   : > { %1598 = vmatprep.mubr.msk.f32.mxu0 %vm319_vm1, %v296_v25  ;;  %v316_v1 = vld [vmem:[%s1761_s9 + $0xf0] sm:$0xff]  ;;  %v317_v3 = vld [vmem:[%s1761_s9 + $0xf8] sm:$0xff] }
  0x23   : > { %v280_v2 = vld [vmem:[%s1766_s12 + $0xf0] sm:$0xff]  ;;  %v281_v4 = vld [vmem:[%s1766_s12 + $0xf8] sm:$0xff] }
  0x24   : > { %1652 = vmatmul.mubr.msk.f32.gmra.mxu1 %vm645_vm2, %v259_v24 }
  0x25   : > { %1654 = vmatprep.mubr.msk.f32.mxu1 %vm645_vm2, %v260_v26  ;;  %1599 = vmatmul.mubr.msk.f32.gmra.mxu0 %vm319_vm1, %v297_v27 }
  0x26   : > { %1601 = vmatprep.mubr.msk.f32.mxu0 %vm319_vm1, %v298_v29 }
  0x28   : > { %1655 = vmatmul.mubr.msk.f32.gmra.mxu1 %vm645_vm2, %v261_v28 }
  0x29   : > { %1657 = vmatprep.mubr.msk.f32.mxu1 %vm645_vm2, %v262_v30  ;;  %1602 = vmatmul.mubr.msk.f32.gmra.mxu0 %vm319_vm1, %v299_v31 }
  0x2a   : > { %1604 = vmatprep.mubr.msk.f32.mxu0 %vm319_vm1, %v300_v33 }
  0x2c   : > { %1658 = vmatmul.mubr.msk.f32.gmra.mxu1 %vm645_vm2, %v263_v32 }
  0x2d   : > { %1660 = vmatprep.mubr.msk.f32.mxu1 %vm645_vm2, %v264_v34  ;;  %1605 = vmatmul.mubr.msk.f32.gmra.mxu0 %vm319_vm1, %v301_v35 }
  0x2e   : > { %1607 = vmatprep.mubr.msk.f32.mxu0 %vm319_vm1, %v302_v37 }
  0x30   : > { %1661 = vmatmul.mubr.msk.f32.gmra.mxu1 %vm645_vm2, %v265_v36 }
  0x31   : > { %1663 = vmatprep.mubr.msk.f32.mxu1 %vm645_vm2, %v266_v38  ;;  %1608 = vmatmul.mubr.msk.f32.gmra.mxu0 %vm319_vm1, %v303_v39 }
  0x32   : > { %1610 = vmatprep.mubr.msk.f32.mxu0 %vm319_vm1, %v304_v41 }
  0x34   : > { %1664 = vmatmul.mubr.msk.f32.gmra.mxu1 %vm645_vm2, %v267_v40 }
  0x35   : > { %1666 = vmatprep.mubr.msk.f32.mxu1 %vm645_vm2, %v268_v42  ;;  %1611 = vmatmul.mubr.msk.f32.gmra.mxu0 %vm319_vm1, %v305_v43 }
  0x36   : > { %1613 = vmatprep.mubr.msk.f32.mxu0 %vm319_vm1, %v306_v45 }
  0x38   : > { %1667 = vmatmul.mubr.msk.f32.gmra.mxu1 %vm645_vm2, %v269_v44  ;;  %v1904_v44 = vld [vmem:[%s2045_s4] ss:$0 sm:$0xff] }
  0x39   : > { %1669 = vmatprep.mubr.msk.f32.mxu1 %vm645_vm2, %v270_v46  ;;  %1614 = vmatmul.mubr.msk.f32.gmra.mxu0 %vm319_vm1, %v307_v47 }
  0x3a   : > { %1616 = vmatprep.mubr.msk.f32.mxu0 %vm319_vm1, %v308_v49 }
  0x3c   : > { %1670 = vmatmul.mubr.msk.f32.gmra.mxu1 %vm645_vm2, %v271_v48 }
  0x3d   : > { %1672 = vmatprep.mubr.msk.f32.mxu1 %vm645_vm2, %v272_v50  ;;  %1617 = vmatmul.mubr.msk.f32.gmra.mxu0 %vm319_vm1, %v309_v51 }
  0x3e   : > { %1619 = vmatprep.mubr.msk.f32.mxu0 %vm319_vm1, %v310_v53 }
  0x40   : > { %1673 = vmatmul.mubr.msk.f32.gmra.mxu1 %vm645_vm2, %v273_v52 }
  0x41   : > { %1675 = vmatprep.mubr.msk.f32.mxu1 %vm645_vm2, %v274_v54  ;;  %1620 = vmatmul.mubr.msk.f32.gmra.mxu0 %vm319_vm1, %v311_v55 }
  0x42   : > { %1622 = vmatprep.mubr.msk.f32.mxu0 %vm319_vm1, %v312_v57 }
  0x44   : > { %1676 = vmatmul.mubr.msk.f32.gmra.mxu1 %vm645_vm2, %v275_v56 }
  0x45   : > { %1678 = vmatprep.mubr.msk.f32.mxu1 %vm645_vm2, %v276_v58  ;;  %1623 = vmatmul.mubr.msk.f32.gmra.mxu0 %vm319_vm1, %v313_v59 }
  0x46   : > { %1625 = vmatprep.mubr.msk.f32.mxu0 %vm319_vm1, %v314_v61 }
  0x48   : > { %1679 = vmatmul.mubr.msk.f32.gmra.mxu1 %vm645_vm2, %v277_v60 }
  0x49   : > { %1681 = vmatprep.mubr.msk.f32.mxu1 %vm645_vm2, %v278_v62  ;;  %1626 = vmatmul.mubr.msk.f32.gmra.mxu0 %vm319_vm1, %v315_v63 }
  0x4a   : > { %1628 = vmatprep.mubr.msk.f32.mxu0 %vm319_vm1, %v316_v1 }
  0x4c   : > { %1682 = vmatmul.mubr.msk.f32.gmra.mxu1 %vm645_vm2, %v279_v0 }
  0x4d   : > { %1684 = vmatprep.mubr.msk.f32.mxu1 %vm645_vm2, %v280_v2  ;;  %1629 = vmatmul.mubr.msk.f32.gmra.mxu0 %vm319_vm1, %v317_v3 }
  0x50   : > { %1685 = vmatmul.mubr.msk.f32.gmra.mxu1 %vm645_vm2, %v281_v4 }
  0xd1   : > { %v1585_v5 = vpop.f32.mrf.mxu0 }
  0xd3   : > { %v486_v8 = vpop.f32.mrf.mxu0 }
  0xd4   : > { %v1641_v6 = vpop.f32.mrf.mxu1 }
  0xd5   : > { %v814_v7 = vadd.f32 %v1641_v6, %v1585_v5  ;;  %v1588_v12 = vpop.f32.mrf.mxu0 }
  0xd6   : > { %v808_v9 = vpop.f32.mrf.mxu1 }
  0xd7   : > { %v974_v10 = vsel %vm645_vm2, %v814_v7, -inf  ;;  %v809_v11 = vadd.f32 %v808_v9, %v486_v8  ;;  %v496_v17 = vpop.f32.mrf.mxu0 }
  0xd8   : > { %v975_v13 = vrot.slane %v974_v10, 4  ;;  %v1644_v14 = vpop.f32.mrf.mxu1 }
  0xd9   : > { %v967_v15 = vsel %vm645_vm2, %v809_v11, -inf  ;;  %v824_v16 = vadd.f32 %v1644_v14, %v1588_v12  ;;  %v1591_v23 = vpop.f32.mrf.mxu0 }
  0xda   : > { %v976_v18 = vmax.f32 %v974_v10, %v975_v13  ;;  %v968_v19 = vrot.slane %v967_v15, 4  ;;  %v818_v20 = vpop.f32.mrf.mxu1 }
  0xdb   : > { %v988_v21 = vsel %vm645_vm2, %v824_v16, -inf  ;;  %v819_v22 = vadd.f32 %v818_v20, %v496_v17  ;;  %v506_v30 = vpop.f32.mrf.mxu0 }
  0xdc   : > { %v977_v24 = vrot.slane %v976_v18, 2  ;;  %v969_v25 = vmax.f32 %v967_v15, %v968_v19  ;;  %v989_v26 = vrot.slane %v988_v21, 4  ;;  %v1647_v27 = vpop.f32.mrf.mxu1 }
  0xdd   : > { %v981_v28 = vsel %vm645_vm2, %v819_v22, -inf  ;;  %v834_v29 = vadd.f32 %v1647_v27, %v1591_v23  ;;  %v1594_v38 = vpop.f32.mrf.mxu0 }
  0xde   : > { %v978_v31 = vmax.f32 %v976_v18, %v977_v24  ;;  %v970_v32 = vrot.slane %v969_v25, 2  ;;  %v990_v33 = vmax.f32 %v988_v21, %v989_v26  ;;  %v982_v34 = vrot.slane %v981_v28, 4  ;;  %v828_v35 = vpop.f32.mrf.mxu1 }
  0xdf   : > { %v1002_v36 = vsel %vm645_vm2, %v834_v29, -inf  ;;  %v829_v37 = vadd.f32 %v828_v35, %v506_v30  ;;  %v516_v48 = vpop.f32.mrf.mxu0 }
  0xe0   : > { %v979_v39 = vrot.slane %v978_v31, 1  ;;  %v971_v40 = vmax.f32 %v969_v25, %v970_v32  ;;  %v991_v41 = vrot.slane %v990_v33, 2  ;;  %v983_v42 = vmax.f32 %v981_v28, %v982_v34  ;;  %v1650_v43 = vpop.f32.mrf.mxu1 }
  0xe1   : > { %v1003_v45 = vrot.slane %v1002_v36, 4  ;;  %v995_v46 = vsel %vm645_vm2, %v829_v37, -inf  ;;  %v844_v47 = vadd.f32 %v1650_v43, %v1594_v38  ;;  %v1597_v58 = vpop.f32.mrf.mxu0 }
  0xe2   : > { %v980_v49 = vmax.f32 %v978_v31, %v979_v39  ;;  %v972_v50 = vrot.slane %v971_v40, 1  ;;  %v992_v51 = vmax.f32 %v990_v33, %v991_v41  ;;  %v984_v52 = vrot.slane %v983_v42, 2  ;;  %v838_v53 = vpop.f32.mrf.mxu1 }
  0xe3   : > { %v1004_v54 = vmax.f32 %v1002_v36, %v1003_v45  ;;  %v996_v55 = vrot.slane %v995_v46, 4  ;;  %v1016_v56 = vsel %vm645_vm2, %v844_v47, -inf  ;;  %v839_v57 = vadd.f32 %v838_v53, %v516_v48  ;;  %v526_v4 = vpop.f32.mrf.mxu0 }
  0xe4   : > { %v1199_v59 = vadd.f32 %v1904_v44, %v980_v49  ;;  %v973_v60 = vmax.f32 %v971_v40, %v972_v50  ;;  %v993_v61 = vrot.slane %v992_v51, 1  ;;  %v985_v62 = vmax.f32 %v983_v42, %v984_v52  ;;  %v1653_v63 = vpop.f32.mrf.mxu1 }
  0xe5   : > { %v1005_v0 = vrot.slane %v1004_v54, 2  ;;  %v997_v1 = vmax.f32 %v995_v46, %v996_v55  ;;  %v1017_v2 = vrot.slane %v1016_v56, 4  ;;  %v1009_v3 = vsel %vm645_vm2, %v839_v57, -inf  ;;  %v1600_v14 = vpop.f32.mrf.mxu0 }
  0xe6   : > { %v1231_v5 = vmax.f32 %v1199_v59, 0.0  ;;  %v1198_v6 = vadd.f32 %v1904_v44, %v973_v60  ;;  %v994_v7 = vmax.f32 %v992_v51, %v993_v61  ;;  %v986_v8 = vrot.slane %v985_v62, 1  ;;  %v848_v9 = vpop.f32.mrf.mxu1 }
  0xe7   : > { %v1006_v10 = vmax.f32 %v1004_v54, %v1005_v0  ;;  %v998_v11 = vrot.slane %v997_v1, 2  ;;  %v1018_v12 = vmax.f32 %v1016_v56, %v1017_v2  ;;  %v1010_v13 = vrot.slane %v1009_v3, 4  ;;  %v536_v24 = vpop.f32.mrf.mxu0 }
  0xe8   : > { %v1294_v15 = vrot.slane %v1231_v5, 7  ;;  %v1230_v16 = vmax.f32 %v1198_v6, 0.0  ;;  %v1201_v17 = vadd.f32 %v1904_v44, %v994_v7  ;;  %v987_v18 = vmax.f32 %v985_v62, %v986_v8  ;;  %v1656_v19 = vpop.f32.mrf.mxu1 }
  0xe9   : > { %v1007_v20 = vrot.slane %v1006_v10, 1  ;;  %v999_v21 = vmax.f32 %v997_v1, %v998_v11  ;;  %v1019_v22 = vrot.slane %v1018_v12, 2  ;;  %v1011_v23 = vmax.f32 %v1009_v3, %v1010_v13  ;;  %v1603_v34 = vpop.f32.mrf.mxu0 }
  0xea   : > { %v1296_v25 = vsel %vm1295_vm3, %v1294_v15, %v1230_v16  ;;  %v1233_v26 = vmax.f32 %v1201_v17, 0.0  ;;  %v1200_v27 = vadd.f32 %v1904_v44, %v987_v18  ;;  %v854_v28 = vadd.f32 %v1653_v63, %v1597_v58  ;;  %v858_v29 = vpop.f32.mrf.mxu1 }
  0xeb   : > { %v1008_v30 = vmax.f32 %v1006_v10, %v1007_v20  ;;  %v1000_v31 = vrot.slane %v999_v21, 1  ;;  %v1020_v32 = vmax.f32 %v1018_v12, %v1019_v22  ;;  %v1012_v33 = vrot.slane %v1011_v23, 2  ;;  %v546_v45 = vpop.f32.mrf.mxu0 }
  0xec   : > { %v1300_v35 = vrot.slane %v1233_v26, 5  ;;  %v1232_v36 = vmax.f32 %v1200_v27, 0.0  ;;  %v1030_v37 = vsel %vm645_vm2, %v854_v28, -inf  ;;  %v849_v38 = vadd.f32 %v848_v9, %v526_v4  ;;  %v1659_v39 = vpop.f32.mrf.mxu1 }
  0xed   : > { %v1203_v40 = vadd.f32 %v1904_v44, %v1008_v30  ;;  %v1001_v41 = vmax.f32 %v999_v21, %v1000_v31  ;;  %v1021_v42 = vrot.slane %v1020_v32, 1  ;;  %v1013_v43 = vmax.f32 %v1011_v23, %v1012_v33  ;;  %v1606_v55 = vpop.f32.mrf.mxu0 }
  0xee   : > { %v1297_v46 = vrot.slane %v1232_v36, 6  ;;  %v1031_v47 = vrot.slane %v1030_v37, 4  ;;  %v1023_v48 = vsel %vm645_vm2, %v849_v38, -inf  ;;  %v864_v49 = vadd.f32 %v1656_v19, %v1600_v14  ;;  %v868_v50 = vpop.f32.mrf.mxu1 }
  0xef   : > { %v1235_v51 = vmax.f32 %v1203_v40, 0.0  ;;  %v1202_v52 = vadd.f32 %v1904_v44, %v1001_v41  ;;  %v1022_v53 = vmax.f32 %v1020_v32, %v1021_v42  ;;  %v1014_v54 = vrot.slane %v1013_v43, 1  ;;  %v1927_v1 = vpop.f32.mrf.mxu0 }
  0xf0   : > { %v1299_v56 = vsel %vm1298_vm4, %v1297_v46, %v1296_v25  ;;  %v1032_v57 = vmax.f32 %v1030_v37, %v1031_v47  ;;  %v1024_v58 = vrot.slane %v1023_v48, 4  ;;  %v1044_v59 = vsel %vm645_vm2, %v864_v49, -inf  ;;  %v1662_v60 = vpop.f32.mrf.mxu1 }
  0xf1   : > { %v1306_v61 = vrot.slane %v1235_v51, 3  ;;  %v1234_v62 = vmax.f32 %v1202_v52, 0.0  ;;  %v1302_v63 = vsel %vm1301_vm5, %v1300_v35, %v1299_v56  ;;  %v1205_v0 = vadd.f32 %v1904_v44, %v1022_v53  ;;  %v1934_v11 = vpop.f32.mrf.mxu0 }
  0xf2   : > { %v1015_v2 = vmax.f32 %v1013_v43, %v1014_v54  ;;  %v1033_v3 = vrot.slane %v1032_v57, 2  ;;  %v1025_v4 = vmax.f32 %v1023_v48, %v1024_v58  ;;  %v1045_v5 = vrot.slane %v1044_v59, 4  ;;  %v878_v6 = vpop.f32.mrf.mxu1 }
  0xf3   : > { %v1303_v7 = vrot.slane %v1234_v62, 4  ;;  %v1237_v8 = vmax.f32 %v1205_v0, 0.0  ;;  %v859_v9 = vadd.f32 %v858_v29, %v536_v24  ;;  %v874_v10 = vadd.f32 %v1659_v39, %v1603_v34  ;;  %v566_v21 = vpop.f32.mrf.mxu0 }
  0xf4   : > { %v1204_v12 = vadd.f32 %v1904_v44, %v1015_v2  ;;  %v1034_v13 = vmax.f32 %v1032_v57, %v1033_v3  ;;  %v1026_v14 = vrot.slane %v1025_v4, 2  ;;  %v1046_v15 = vmax.f32 %v1044_v59, %v1045_v5  ;;  %v1665_v16 = vpop.f32.mrf.mxu1 }
  0xf5   : > { %v1305_v17 = vsel %vm1304_vm6, %v1303_v7, %v1302_v63  ;;  %v1312_v18 = vrot.slane %v1237_v8, 1  ;;  %v1037_v19 = vsel %vm645_vm2, %v859_v9, -inf  ;;  %v1058_v20 = vsel %vm645_vm2, %v874_v10, -inf  ;;  %v1942_v31 = vpop.f32.mrf.mxu0 }
  0xf6   : > { %v1236_v22 = vmax.f32 %v1204_v12, 0.0  ;;  %v1308_v23 = vsel %vm1307_vm7, %v1306_v61, %v1305_v17  ;;  %v1035_v24 = vrot.slane %v1034_v13, 1  ;;  %v1027_v25 = vmax.f32 %v1025_v4, %v1026_v14  ;;  %v888_v26 = vpop.f32.mrf.mxu1 }
  0xf7   : > { %v1047_v27 = vrot.slane %v1046_v15, 2  ;;  %v1038_v28 = vrot.slane %v1037_v19, 4  ;;  %v1059_v29 = vrot.slane %v1058_v20, 4  ;;  %v869_v30 = vadd.f32 %v868_v50, %v546_v45  ;;  %v1955_v50 = vpop.f32.mrf.mxu0 }
  0xf8   : > { %v1309_v32 = vrot.slane %v1236_v22, 2  ;;  %v1036_v33 = vmax.f32 %v1034_v13, %v1035_v24  ;;  %v1028_v34 = vrot.slane %v1027_v25, 1  ;;  %v884_v35 = vadd.f32 %v1662_v60, %v1606_v55  ;;  %v1944_v36 = vpop.f32.mrf.mxu1 }
  0xf9   : > { %v1048_v37 = vmax.f32 %v1046_v15, %v1047_v27  ;;  %v1039_v38 = vmax.f32 %v1037_v19, %v1038_v28  ;;  %v1060_v39 = vmax.f32 %v1058_v20, %v1059_v29  ;;  %v1051_v40 = vsel %vm645_vm2, %v869_v30, -inf  ;;  %v1615_v5 = vpop.f32.mrf.mxu0 }
  0xfa   : > { %v1311_v41 = vsel %vm1310_vm8, %v1309_v32, %v1308_v23  ;;  %v1207_v42 = vadd.f32 %v1904_v44, %v1036_v33  ;;  %v1029_v43 = vmax.f32 %v1027_v25, %v1028_v34  ;;  %v1052_v45 = vrot.slane %v1051_v40, 4  ;;  %v1957_v51 = vpop.f32.mrf.mxu1 }
  0xfb   : > { %v1314_v46 = vsel %vm1313_vm9, %v1312_v18, %v1311_v41  ;;  %v1049_v47 = vrot.slane %v1048_v37, 1  ;;  %v1040_v48 = vrot.slane %v1039_v38, 2  ;;  %v1061_v49 = vrot.slane %v1060_v39, 2  ;;  %v586_v24 = vpop.f32.mrf.mxu0 }
  0xfc   : > { %1361 = vst.msk [vmem:[%s1949_s20] sm:$0xff] %vm645_vm2, %v1314_v46  ;;  %v1239_v52 = vmax.f32 %v1207_v42, 0.0  ;;  %v1206_v53 = vadd.f32 %v1904_v44, %v1029_v43  ;;  %v1053_v54 = vmax.f32 %v1051_v40, %v1052_v45  ;;  %v1072_v55 = vsel %vm645_vm2, %v884_v35, -inf  ;;  %v1671_v7 = vpop.f32.mrf.mxu1 }
  0xfd   : > { %v1050_v56 = vmax.f32 %v1048_v37, %v1049_v47  ;;  %v1041_v57 = vmax.f32 %v1039_v38, %v1040_v48  ;;  %v1062_v58 = vmax.f32 %v1060_v39, %v1061_v49  ;;  %v1073_v59 = vrot.slane %v1072_v55, 4  ;;  %v1618_v41 = vpop.f32.mrf.mxu0 }
  0xfe   : > { %v1315_v60 = vrot.slane %v1239_v52, 7  ;;  %v1238_v61 = vmax.f32 %v1206_v53, 0.0  ;;  %v1054_v62 = vrot.slane %v1053_v54, 2  ;;  %v879_v63 = vadd.f32 %v878_v6, %v1927_v1  ;;  %v908_v25 = vpop.f32.mrf.mxu1 }
  0xff   : > { %v1209_v0 = vadd.f32 %v1904_v44, %v1050_v56  ;;  %v1042_v2 = vrot.slane %v1041_v57, 1  ;;  %v1063_v3 = vrot.slane %v1062_v58, 1  ;;  %v1074_v4 = vmax.f32 %v1072_v55, %v1073_v59  ;;  %v596_v59 = vpop.f32.mrf.mxu0 }
 0x100   : > { %v1055_v8 = vmax.f32 %v1053_v54, %v1054_v62  ;;  %v1065_v9 = vsel %vm645_vm2, %v879_v63, -inf  ;;  %v894_v10 = vadd.f32 %v1665_v16, %v1934_v11  ;;  %v889_v6 = vadd.f32 %v888_v26, %v566_v21  ;;  %v1674_v42 = vpop.f32.mrf.mxu1 }
 0x101   : > { %v1241_v12 = vmax.f32 %v1209_v0, 0.0  ;;  %v1043_v13 = vmax.f32 %v1041_v57, %v1042_v2  ;;  %v1064_v14 = vmax.f32 %v1062_v58, %v1063_v3  ;;  %v1075_v15 = vrot.slane %v1074_v4, 2 }
 0x102   : > { %v1056_v17 = vrot.slane %v1055_v8, 1  ;;  %v1066_v18 = vrot.slane %v1065_v9, 4  ;;  %v1086_v1 = vsel %vm645_vm2, %v894_v10, -inf  ;;  %v1316_v19 = vsel %vm1295_vm3, %v1315_v60, %v1238_v61  ;;  %v918_v60 = vpop.f32.mrf.mxu1 }
 0x103   : > { %v1208_v20 = vadd.f32 %v1904_v44, %v1043_v13  ;;  %v1211_v22 = vadd.f32 %v1904_v44, %v1064_v14  ;;  %v1076_v23 = vmax.f32 %v1074_v4, %v1075_v15  ;;  %v1087_v16 = vrot.slane %v1086_v1, 4 }
 0x104   : > { %v1057_v27 = vmax.f32 %v1055_v8, %v1056_v17  ;;  %v1067_v11 = vmax.f32 %v1065_v9, %v1066_v18  ;;  %v1079_v28 = vsel %vm645_vm2, %v889_v6, -inf  ;;  %v1319_v29 = vrot.slane %v1241_v12, 5  ;;  %v1621_v17 = vpop.f32.mrf.mxu0  ;;  %v1677_v18 = vpop.f32.mrf.mxu1 }
 0x105   : > { %v1240_v30 = vmax.f32 %v1208_v20, 0.0  ;;  %v1077_v32 = vrot.slane %v1076_v23, 1  ;;  %v1080_v33 = vrot.slane %v1079_v28, 4  ;;  %v1088_v34 = vmax.f32 %v1086_v1, %v1087_v16 }
 0x106   : > { %v1210_v21 = vadd.f32 %v1904_v44, %v1057_v27  ;;  %v1068_v26 = vrot.slane %v1067_v11, 2  ;;  %v904_v35 = vadd.f32 %v1944_v36, %v1942_v31  ;;  %v1243_v38 = vmax.f32 %v1211_v22, 0.0 }
 0x107   : > { %v1317_v37 = vrot.slane %v1240_v30, 6  ;;  %v1078_v39 = vmax.f32 %v1076_v23, %v1077_v32  ;;  %v1081_v40 = vmax.f32 %v1079_v28, %v1080_v33  ;;  %v1089_v46 = vrot.slane %v1088_v34, 2  ;;  %v928_v33 = vpop.f32.mrf.mxu1 }
 0x108   : > { %v1242_v43 = vmax.f32 %v1210_v21, 0.0  ;;  %v1069_v45 = vmax.f32 %v1067_v11, %v1068_v26  ;;  %v1100_v47 = vsel %vm645_vm2, %v904_v35, -inf  ;;  %v899_v58 = vadd.f32 %v1957_v51, %v1955_v50 }
 0x109   : > { %v1318_v48 = vsel %vm1298_vm4, %v1317_v37, %v1316_v19  ;;  %v1213_v49 = vadd.f32 %v1904_v44, %v1078_v39  ;;  %v1082_v52 = vrot.slane %v1081_v40, 2  ;;  %v1101_v53 = vrot.slane %v1100_v47, 4 }
 0x10a   : > { %v1321_v54 = vrot.slane %v1242_v43, 4  ;;  %v1070_v55 = vrot.slane %v1069_v45, 1  ;;  %v1090_v31 = vmax.f32 %v1088_v34, %v1089_v46  ;;  %v1320_v36 = vsel %vm1301_vm5, %v1319_v29, %v1318_v48 }
 0x10b   : > { %v1083_v56 = vmax.f32 %v1081_v40, %v1082_v52  ;;  %v1102_v57 = vmax.f32 %v1100_v47, %v1101_v53  ;;  %v1245_v61 = vmax.f32 %v1213_v49, 0.0  ;;  %v914_v0 = vadd.f32 %v1671_v7, %v1615_v5  ;;  %v1680_v52 = vpop.f32.mrf.mxu1 }
 0x10c   : > { %v1071_v62 = vmax.f32 %v1069_v45, %v1070_v55  ;;  %v1091_v63 = vrot.slane %v1090_v31, 1  ;;  %v1323_v2 = vrot.slane %v1243_v38, 3  ;;  %v1322_v3 = vsel %vm1304_vm6, %v1321_v54, %v1320_v36 }
 0x10d   : > { %v1084_v4 = vrot.slane %v1083_v56, 1  ;;  %v1103_v8 = vrot.slane %v1102_v57, 2  ;;  %v1093_v12 = vsel %vm645_vm2, %v899_v58, -inf  ;;  %v1114_v13 = vsel %vm645_vm2, %v914_v0, -inf }
 0x10e   : > { %v1212_v9 = vadd.f32 %v1904_v44, %v1071_v62  ;;  %v1092_v10 = vmax.f32 %v1090_v31, %v1091_v63  ;;  %v1094_v51 = vrot.slane %v1093_v12, 4  ;;  %v1115_v15 = vrot.slane %v1114_v13, 4 }
 0x10f   : > { %v1085_v14 = vmax.f32 %v1083_v56, %v1084_v4  ;;  %v1104_v50 = vmax.f32 %v1102_v57, %v1103_v8  ;;  %v1327_v1 = vrot.slane %v1245_v61, 1  ;;  %v909_v7 = vadd.f32 %v908_v25, %v586_v24  ;;  %v606_v25 = vpop.f32.mrf.mxu0  ;;  %v938_v8 = vpop.f32.mrf.mxu1 }
 0x110   : > { %v1244_v5 = vmax.f32 %v1212_v9, 0.0  ;;  %v924_v6 = vadd.f32 %v1674_v42, %v1618_v41  ;;  %v1215_v19 = vadd.f32 %v1904_v44, %v1092_v10  ;;  %v1095_v22 = vmax.f32 %v1093_v12, %v1094_v51 }
 0x111   : > { %v1105_v20 = vrot.slane %v1104_v50, 1  ;;  %v1116_v23 = vmax.f32 %v1114_v13, %v1115_v15  ;;  %v1987_v11 = vadd.f32 %v1904_v44, %v1085_v14  ;;  %v1107_v16 = vsel %vm645_vm2, %v909_v7, -inf  ;;  %v1624_v49 = vpop.f32.mrf.mxu0 }
 0x112   : > { %v1325_v27 = vrot.slane %v1244_v5, 2  ;;  %v1128_v28 = vsel %vm645_vm2, %v924_v6, -inf  ;;  %v1324_v29 = vsel %vm1307_vm7, %v1323_v2, %v1322_v3  ;;  %v1096_v32 = vrot.slane %v1095_v22, 2 }
 0x113   : > { %v1106_v30 = vmax.f32 %v1104_v50, %v1105_v20  ;;  %v1117_v24 = vrot.slane %v1116_v23, 2  ;;  %v1108_v26 = vrot.slane %v1107_v16, 4  ;;  %v1129_v34 = vrot.slane %v1128_v28, 4  ;;  %v616_v4 = vpop.f32.mrf.mxu0 }
 0x114   : > { %v1326_v21 = vsel %vm1310_vm8, %v1325_v27, %v1324_v29  ;;  %v1247_v37 = vmax.f32 %v1215_v19, 0.0  ;;  %v1097_v38 = vmax.f32 %v1095_v22, %v1096_v32  ;;  %v1246_v40 = vmax.f32 %v1987_v11, 0.0  ;;  %v1683_v22 = vpop.f32.mrf.mxu1 }
 0x115   : > { %v1328_v35 = vsel %vm1313_vm9, %v1327_v1, %v1326_v21  ;;  %v1118_v39 = vmax.f32 %v1116_v23, %v1117_v24  ;;  %v1109_v41 = vmax.f32 %v1107_v16, %v1108_v26  ;;  %v1130_v42 = vmax.f32 %v1128_v28, %v1129_v34  ;;  %v1627_v20 = vpop.f32.mrf.mxu0 }
 0x116   : > { %1362 = vst.msk [vmem:[%s1949_s20 + $0x8] sm:$0xff] %vm645_vm2, %v1328_v35  ;;  %v919_v43 = vadd.f32 %v918_v60, %v596_v59  ;;  %v1217_v45 = vadd.f32 %v1904_v44, %v1106_v30  ;;  %v1098_v46 = vrot.slane %v1097_v38, 1  ;;  %v934_v48 = vadd.f32 %v1677_v18, %v1621_v17 }
 0x117   : > { %v1119_v47 = vrot.slane %v1118_v39, 1  ;;  %v1110_v53 = vrot.slane %v1109_v41, 2  ;;  %v1131_v54 = vrot.slane %v1130_v42, 2  ;;  %v929_v31 = vadd.f32 %v928_v33, %v606_v25 }
 0x118   : > { %v1121_v55 = vsel %vm645_vm2, %v919_v43, -inf  ;;  %v1329_v36 = vrot.slane %v1247_v37, 7  ;;  %v1099_v56 = vmax.f32 %v1097_v38, %v1098_v46  ;;  %v1142_v59 = vsel %vm645_vm2, %v934_v48, -inf  ;;  %v626_v37 = vpop.f32.mrf.mxu0  ;;  %v948_v38 = vpop.f32.mrf.mxu1 }
 0x119   : > { %v1120_v57 = vmax.f32 %v1118_v39, %v1119_v47  ;;  %v1122_v58 = vrot.slane %v1121_v55, 4  ;;  %v1111_v61 = vmax.f32 %v1109_v41, %v1110_v53  ;;  %v1132_v62 = vmax.f32 %v1130_v42, %v1131_v54 }
 0x11a   : > { %v1135_v60 = vsel %vm645_vm2, %v929_v31, -inf  ;;  %v1249_v63 = vmax.f32 %v1217_v45, 0.0  ;;  %v1216_v0 = vadd.f32 %v1904_v44, %v1099_v56  ;;  %v1143_v3 = vrot.slane %v1142_v59, 4  ;;  %v1686_v56 = vpop.f32.mrf.mxu1 }
 0x11b   : > { %v1123_v2 = vmax.f32 %v1121_v55, %v1122_v58  ;;  %v1112_v9 = vrot.slane %v1111_v61, 1  ;;  %v1133_v10 = vrot.slane %v1132_v62, 1  ;;  %v1136_v12 = vrot.slane %v1135_v60, 4 }
 0x11c   : > { %v944_v13 = vadd.f32 %v1680_v52, %v1624_v49  ;;  %v1248_v14 = vmax.f32 %v1216_v0, 0.0  ;;  %v1219_v50 = vadd.f32 %v1904_v44, %v1120_v57  ;;  %v1144_v15 = vmax.f32 %v1142_v59, %v1143_v3 }
 0x11d   : > { %v1124_v51 = vrot.slane %v1123_v2, 2  ;;  %v1113_v17 = vmax.f32 %v1111_v61, %v1112_v9  ;;  %v1134_v18 = vmax.f32 %v1132_v62, %v1133_v10  ;;  %v1137_v1 = vmax.f32 %v1135_v60, %v1136_v12 }
 0x11e   : > { %v1156_v5 = vsel %vm645_vm2, %v944_v13, -inf  ;;  %v1331_v7 = vrot.slane %v1248_v14, 6  ;;  %v1145_v19 = vrot.slane %v1144_v15, 2  ;;  %v939_v30 = vadd.f32 %v938_v8, %v616_v4  ;;  %v958_v14 = vpop.f32.mrf.mxu1 }
 0x11f   : > { %v1125_v6 = vmax.f32 %v1123_v2, %v1124_v51  ;;  %v1218_v23 = vadd.f32 %v1904_v44, %v1113_v17  ;;  %v1221_v27 = vadd.f32 %v1904_v44, %v1134_v18  ;;  %v1138_v11 = vrot.slane %v1137_v1, 2 }
 0x120   : > { %v1157_v16 = vrot.slane %v1156_v5, 4  ;;  %v1146_v29 = vmax.f32 %v1144_v15, %v1145_v19  ;;  %v1330_v32 = vsel %vm1295_vm3, %v1329_v36, %v1246_v40  ;;  %v1333_v24 = vrot.slane %v1249_v63, 5  ;;  %v1630_v36 = vpop.f32.mrf.mxu0 }
 0x121   : > { %v1126_v28 = vrot.slane %v1125_v6, 1  ;;  %v1251_v25 = vmax.f32 %v1219_v50, 0.0  ;;  %v1250_v33 = vmax.f32 %v1218_v23, 0.0  ;;  %v1332_v21 = vsel %vm1298_vm4, %v1331_v7, %v1330_v32 }
 0x122   : > { %v1158_v34 = vmax.f32 %v1156_v5, %v1157_v16  ;;  %v1149_v35 = vsel %vm645_vm2, %v939_v30, -inf  ;;  %v1253_v41 = vmax.f32 %v1221_v27, 0.0  ;;  %v1139_v42 = vmax.f32 %v1137_v1, %v1138_v11  ;;  %v636_v13 = vpop.f32.mrf.mxu0 }
 0x123   : > { %v1127_v26 = vmax.f32 %v1125_v6, %v1126_v28  ;;  %v1335_v39 = vrot.slane %v1250_v33, 4  ;;  %v1150_v43 = vrot.slane %v1149_v35, 4  ;;  %v1147_v46 = vrot.slane %v1146_v29, 1 }
 0x124   : > { %v1159_v47 = vrot.slane %v1158_v34, 2  ;;  %v954_v40 = vadd.f32 %v1683_v22, %v1627_v20  ;;  %v1334_v48 = vsel %vm1301_vm5, %v1333_v24, %v1332_v21  ;;  %v949_v52 = vadd.f32 %v948_v38, %v626_v37 }
 0x125   : > { %v1220_v45 = vadd.f32 %v1904_v44, %v1127_v26  ;;  %v1151_v49 = vmax.f32 %v1149_v35, %v1150_v43  ;;  %v1337_v53 = vrot.slane %v1251_v25, 3  ;;  %v1336_v54 = vsel %vm1304_vm6, %v1335_v39, %v1334_v48 }
 0x126   : > { %v1160_v31 = vmax.f32 %v1158_v34, %v1159_v47  ;;  %v1341_v57 = vrot.slane %v1253_v41, 1  ;;  %v1170_v61 = vsel %vm645_vm2, %v954_v40, -inf  ;;  %v1163_v62 = vsel %vm645_vm2, %v949_v52, -inf }
 0x127   : > { %v1252_v55 = vmax.f32 %v1220_v45, 0.0  ;;  %v1152_v58 = vrot.slane %v1151_v49, 2  ;;  %v1148_v60 = vmax.f32 %v1146_v29, %v1147_v46  ;;  %v1140_v63 = vrot.slane %v1139_v42, 1 }
 0x128   : > { %v1171_v0 = vrot.slane %v1170_v61, 4  ;;  %v1338_v2 = vsel %vm1307_vm7, %v1337_v53, %v1336_v54  ;;  %v1164_v4 = vrot.slane %v1163_v62, 4  ;;  %v964_v8 = vadd.f32 %v1686_v56, %v1630_v36 }
 0x129   : > { %v1339_v59 = vrot.slane %v1252_v55, 2  ;;  %v1153_v3 = vmax.f32 %v1151_v49, %v1152_v58  ;;  %v1161_v10 = vrot.slane %v1160_v31, 1  ;;  %v1141_v18 = vmax.f32 %v1139_v42, %v1140_v63 }
 0x12a   : > { %v1172_v12 = vmax.f32 %v1170_v61, %v1171_v0  ;;  %v1165_v15 = vmax.f32 %v1163_v62, %v1164_v4  ;;  %v1184_v17 = vsel %vm645_vm2, %v964_v8, -inf  ;;  %v1223_v7 = vadd.f32 %v1904_v44, %v1148_v60 }
 0x12b   : > { %v1340_v9 = vsel %vm1310_vm8, %v1339_v59, %v1338_v2  ;;  %v1154_v51 = vrot.slane %v1153_v3, 1  ;;  %v1185_v5 = vrot.slane %v1184_v17, 4  ;;  %v959_v20 = vadd.f32 %v958_v14, %v636_v13 }
 0x12c   : > { %v1342_v50 = vsel %vm1313_vm9, %v1341_v57, %v1340_v9  ;;  %v1173_v1 = vrot.slane %v1172_v12, 2  ;;  %v1166_v19 = vrot.slane %v1165_v15, 2  ;;  %v1162_v27 = vmax.f32 %v1160_v31, %v1161_v10 }
 0x12d   : > { %1363 = vst.msk [vmem:[%s1949_s20 + $0x10] sm:$0xff] %vm645_vm2, %v1342_v50  ;;  %v1155_v6 = vmax.f32 %v1153_v3, %v1154_v51  ;;  %v1186_v23 = vmax.f32 %v1184_v17, %v1185_v5  ;;  %v1177_v28 = vsel %vm645_vm2, %v959_v20, -inf  ;;  %v1255_v24 = vmax.f32 %v1223_v7, 0.0 }
 0x12e   : > { %v1174_v22 = vmax.f32 %v1172_v12, %v1173_v1  ;;  %v1167_v16 = vmax.f32 %v1165_v15, %v1166_v19  ;;  %v1178_v32 = vrot.slane %v1177_v28, 4  ;;  %v1222_v25 = vadd.f32 %v1904_v44, %v1141_v18 }
 0x12f   : > { %v1224_v11 = vadd.f32 %v1904_v44, %v1155_v6  ;;  %v1187_v30 = vrot.slane %v1186_v23, 2  ;;  %v1225_v35 = vadd.f32 %v1904_v44, %v1162_v27  ;;  %v1343_v42 = vrot.slane %v1255_v24, 7 }
 0x130   : > { %v1175_v29 = vrot.slane %v1174_v22, 1  ;;  %v1168_v33 = vrot.slane %v1167_v16, 1  ;;  %v1179_v34 = vmax.f32 %v1177_v28, %v1178_v32  ;;  %v1254_v43 = vmax.f32 %v1222_v25, 0.0 }
 0x131   : > { %v1256_v21 = vmax.f32 %v1224_v11, 0.0  ;;  %v1188_v26 = vmax.f32 %v1186_v23, %v1187_v30  ;;  %v1257_v48 = vmax.f32 %v1225_v35, 0.0 }
 0x132   : > { %v1176_v37 = vmax.f32 %v1174_v22, %v1175_v29  ;;  %v1169_v38 = vmax.f32 %v1167_v16, %v1168_v33  ;;  %v1180_v41 = vrot.slane %v1179_v34, 2  ;;  %v1344_v54 = vsel %vm1295_vm3, %v1343_v42, %v1254_v43 }
 0x133   : > { %v1189_v39 = vrot.slane %v1188_v26, 1  ;;  %v1345_v46 = vrot.slane %v1256_v21, 6  ;;  %v1347_v57 = vrot.slane %v1257_v48, 5 }
 0x134   : > { %v1226_v45 = vadd.f32 %v1904_v44, %v1169_v38  ;;  %v1181_v40 = vmax.f32 %v1179_v34, %v1180_v41  ;;  %v1227_v49 = vadd.f32 %v1904_v44, %v1176_v37 }
 0x135   : > { %v1190_v47 = vmax.f32 %v1188_v26, %v1189_v39  ;;  %v1346_v31 = vsel %vm1298_vm4, %v1345_v46, %v1344_v54 }
 0x136   : > { %v1258_v52 = vmax.f32 %v1226_v45, 0.0  ;;  %v1182_v53 = vrot.slane %v1181_v40, 1  ;;  %v1259_v58 = vmax.f32 %v1227_v49, 0.0  ;;  %v1348_v62 = vsel %vm1301_vm5, %v1347_v57, %v1346_v31 }
 0x137   : > { %v1229_v55 = vadd.f32 %v1904_v44, %v1190_v47 }
 0x138   : > { %v1349_v36 = vrot.slane %v1258_v52, 4  ;;  %v1183_v56 = vmax.f32 %v1181_v40, %v1182_v53  ;;  %v1351_v0 = vrot.slane %v1259_v58, 3 }
 0x139   : > { %v1261_v59 = vmax.f32 %v1229_v55, 0.0 }
 0x13a   : > { %v1228_v61 = vadd.f32 %v1904_v44, %v1183_v56  ;;  %v1350_v60 = vsel %vm1304_vm6, %v1349_v36, %v1348_v62 }
 0x13b   : > { %v1355_v3 = vrot.slane %v1261_v59, 1  ;;  %v1352_v4 = vsel %vm1307_vm7, %v1351_v0, %v1350_v60 }
 0x13c   : > { %v1260_v63 = vmax.f32 %v1228_v61, 0.0 }
 0x13e   : > { %v1353_v2 = vrot.slane %v1260_v63, 2 }
 0x140   : > { %v1354_v8 = vsel %vm1310_vm8, %v1353_v2, %v1352_v4 }
 0x141   : > { %v1356_v9 = vsel %vm1313_vm9, %v1355_v3, %v1354_v8 }
 0x142   : > { %1364 = vst.msk [vmem:[%s1949_s20 + $0x18] sm:$0xff] %vm645_vm2, %v1356_v9 }
 0x143 PF: > { %s15_s18 = sadd.s32 1, %s1701_s18  }
 0x144   : > { %p12_p5 = scmp.ge.s32.totalorder %s15_s18, 4  }
 0x146   :  { %14 = sbr.rel (!%p12_p5) target bundleno = 1 (0x1), region = 73 }

</bundles_post_ra>
